<compile_context>
chip_gen: v6e
topology: v6e:2x2x1
jax: 0.10.0
libtpu: 0.0.40
codegen_flags: <defaults>
</compile_context>

<pallas_src>
import math

import jax
import jax.numpy as jnp
from jax.experimental import pallas as pl
from jax.experimental.pallas import tpu as pltpu


def _round_up(n, m):
    return ((n + m - 1) // m) * m


def _confidence_kernel(x_ref, w_ref, b_ref, o_ref):
    # x_ref: [TB, D] (VMEM), w_ref: [D, k] (VMEM), b_ref: [1] (SMEM scalar),
    # o_ref: [TB, k] (VMEM).
    logits = jnp.dot(x_ref[...], w_ref[...],
                     preferred_element_type=jnp.float32)      # [TB, k], MXU
    logits = logits + b_ref[0]
    # Exact sigmoid: exp on the EUP, one divide; kernel is HBM-bound anyway.
    o_ref[...] = (1.0 / (1.0 + jnp.exp(-logits))).astype(o_ref.dtype)


def _choose_tile_rows(rows, D, target_bytes):
    """Pick the batch-tile row count from a per-buffer byte budget."""
    bytes_per_row = 4 * _round_up(D, 128)          # f32, lane-padded in VMEM
    budget_rows = max(8, (target_bytes // max(bytes_per_row, 1)) // 8 * 8)
    if rows <= 128:
        # Single full block: block dim == full array dim satisfies the
        # (8,128)/full-dim rule even when rows is not a multiple of 8.
        return rows
    tb = min(budget_rows, _round_up(rows, 8))
    # Guarantee >= 2 grid steps so the "parallel" axis can shard across
    # v7x's two TensorCores (and pipelining has something to overlap).
    if pl.cdiv(rows, tb) < 2:
        tb = max(8, _round_up(pl.cdiv(rows, 2), 8))
    return tb


def early_exit_confidence(x, weight, bias, *, target_tile_bytes=6 * 1024 * 1024):
    """x: [B, in_size]; weight: [1, in_size] (PyTorch layout); bias: [1]."""
    B, in_size = x.shape
    assert weight.shape == (1, in_size)
    dtype = x.dtype

    # --- Row packing for narrow features: view k rows as one 128-wide lane row.
    k = 1
    if in_size < 128 and (128 % in_size == 0):
        kc = 128 // in_size
        if B % kc == 0:
            k = kc
    rows = B // k
    D = in_size * k
    xp = x.reshape(rows, D)                        # free (bitcast) reshape

    # Block-diagonal transposed weight [D, k]; for k == 1 this is just W.T.
    w_row = weight.reshape(in_size).astype(dtype)
    eye = jnp.eye(k, dtype=dtype)
    wT = (eye[:, None, :] * w_row[None, :, None]).reshape(D, k)

    b_smem = bias.reshape(1).astype(jnp.float32)

    TB = _choose_tile_rows(rows, D, target_tile_bytes)
    grid = pl.cdiv(rows, TB)                       # no jnp.pad: partial last block

    out = pl.pallas_call(
        _confidence_kernel,
        out_shape=jax.ShapeDtypeStruct((rows, k), dtype),
        grid=(grid,),
        in_specs=[
            pl.BlockSpec((TB, D), lambda i: (i, 0)),               # x tile (streamed)
            pl.BlockSpec((D, k), lambda i: (0, 0)),                # W^T (grid-invariant)
            pl.BlockSpec(memory_space=pltpu.MemorySpace.SMEM),     # bias scalar
        ],
        out_specs=pl.BlockSpec((TB, k), lambda i: (i, 0)),
        compiler_params=pltpu.CompilerParams(
            dimension_semantics=("parallel",),
            vmem_limit_bytes=48 * 1024 * 1024,
        ),
    )(xp, wT, b_smem)

    # [rows, k] -> [B, 1] (row-major, so element (r*k + j) is original row r*k+j).
    return out.reshape(B, 1)


if __name__ == "__main__":
    key = jax.random.PRNGKey(0)
    B, in_size = 8, 32

    kx, kw, kb = jax.random.split(key, 3)
    x = jax.random.normal(kx, (B, in_size), dtype=jnp.float32)
    # Deterministic nn.Linear-style init (uniform in +/- 1/sqrt(in_size)).
    bound = 1.0 / math.sqrt(in_size)
    weight = jax.random.uniform(kw, (1, in_size), dtype=jnp.float32,
                                minval=-bound, maxval=bound)
    bias = jax.random.uniform(kb, (1,), dtype=jnp.float32,
                              minval=-bound, maxval=bound)

    out = early_exit_confidence(x, weight, bias)
    out = jax.block_until_ready(out)

    # Pure-JAX reference.
    ref = jax.nn.sigmoid(x @ weight.T + bias)
    assert out.shape == (B, 1)
    assert jnp.allclose(out, ref, atol=1e-5, rtol=1e-5)
    assert bool(jnp.all((out >= 0.0) & (out <= 1.0)))

    print("KERNEL_OK")
</pallas_src>

<mosaic_0001>
module attributes {stable_mosaic.version = 11 : i64} {
  func.func @_confidence_kernel(%arg0: i32, %arg1: memref<2x128xf32, #tpu.memory_space<vmem>>, %arg2: memref<128x4xf32, #tpu.memory_space<vmem>>, %arg3: memref<1xf32, #tpu.memory_space<smem>>, %arg4: memref<2x4xf32, #tpu.memory_space<vmem>>) attributes {dimension_semantics = [#tpu.dimension_semantics<parallel>], iteration_bounds = array<i64: 1>, scalar_prefetch = 0 : i64, scratch_operands = 0 : i64, tpu.core_type = #tpu.core_type<tc>, window_params = [{transform_indices = @transform_0, window_bounds = array<i64: 2, 128>}, {pipeline_mode = #tpu.pipeline_mode<synchronous>, transform_indices = @transform_1, window_bounds = array<i64: 128, 4>}, {transform_indices = @transform_2, window_bounds = array<i64: 1>}, {transform_indices = @transform_3, window_bounds = array<i64: 2, 4>}]} {
    %c0 = arith.constant 0 : index
    %c0_0 = arith.constant 0 : index
    %0 = vector.load %arg1[%c0, %c0_0] : memref<2x128xf32, #tpu.memory_space<vmem>>, vector<2x128xf32>
    %c0_1 = arith.constant 0 : index
    %c0_2 = arith.constant 0 : index
    %1 = vector.load %arg2[%c0_1, %c0_2] : memref<128x4xf32, #tpu.memory_space<vmem>>, vector<128x4xf32>
    %cst = arith.constant dense<0.000000e+00> : vector<2x4xf32>
    %2 = tpu.matmul %0, %1, %cst {dimension_numbers = #tpu.dot_dimension_numbers<[1], [0], [0], [1], [0, 0, 1, 1], [], []>} : vector<2x128xf32>, vector<128x4xf32>, vector<2x4xf32> -> vector<2x4xf32>
    %c0_3 = arith.constant 0 : index
    %3 = memref.load %arg3[%c0_3] : memref<1xf32, #tpu.memory_space<smem>>
    %4 = vector.broadcast %3 : f32 to vector<2x4xf32>
    %5 = arith.addf %2, %4 : vector<2x4xf32>
    %cst_4 = arith.constant 0.000000e+00 : f32
    %6 = vector.broadcast %cst_4 : f32 to vector<2x4xf32>
    %7 = arith.subf %6, %5 : vector<2x4xf32>
    %8 = math.exp %7 : vector<2x4xf32>
    %cst_5 = arith.constant 1.000000e+00 : f32
    %9 = vector.broadcast %cst_5 : f32 to vector<2x4xf32>
    %10 = arith.addf %9, %8 : vector<2x4xf32>
    %cst_6 = arith.constant 1.000000e+00 : f32
    %11 = vector.broadcast %cst_6 : f32 to vector<2x4xf32>
    %12 = arith.divf %11, %10 : vector<2x4xf32>
    %c0_7 = arith.constant 0 : index
    %c0_8 = arith.constant 0 : index
    %13 = vector.load %arg4[%c0_7, %c0_8] : memref<2x4xf32, #tpu.memory_space<vmem>>, vector<2x4xf32>
    tpu.vector_store %arg4[%c0_7, %c0_8], %12 {strides = array<i32>} : memref<2x4xf32, #tpu.memory_space<vmem>>, vector<2x4xf32>,
    return
  }
  func.func @transform_0(%arg0: i32) -> (i32, i32) {
    %c0_i32 = arith.constant 0 : i32
    %c0_i32_0 = arith.constant 0 : i32
    return %arg0, %c0_i32 : i32, i32
  }
  func.func @transform_1(%arg0: i32) -> (i32, i32) {
    %c0_i32 = arith.constant 0 : i32
    %c0_i32_0 = arith.constant 0 : i32
    %c0_i32_1 = arith.constant 0 : i32
    return %c0_i32, %c0_i32_0 : i32, i32
  }
  func.func @transform_2(%arg0: i32) -> i32 {
    %c0_i32 = arith.constant 0 : i32
    %c0_i32_0 = arith.constant 0 : i32
    return %c0_i32 : i32
  }
  func.func @transform_3(%arg0: i32) -> (i32, i32) {
    %c0_i32 = arith.constant 0 : i32
    %c0_i32_0 = arith.constant 0 : i32
    return %arg0, %c0_i32 : i32, i32
  }
}

</mosaic_0001>

<bundles_post_ra>
// kernel: tpu_custom_call.1
= control target key start
LH: loop header
LB: loop body
LE: loop exit
PB: predicated region body
PF: predicated region fallthrough
CT: control target
= control target key end

     0   :  { %v208_v1 = vmov 0.0   ;;  %vm209_vm0 = vmmov 0   ;;  %s288_s0 = inlined_call_operand.vmem [shape: f32[2,128], index: 0, kind: input, shape index: {}]   ;;  %s289_s1 = inlined_call_operand.vmem [shape: f32[128,4], index: 1, kind: input, shape index: {}]   ;;  %s290_s2 = inlined_call_operand.<no memory space> [shape: f32[1], index: 2, kind: input, shape index: {}]   ;;  %s291_s3 = inlined_call_operand.hbm [shape: f32[2,4], index: 3, kind: output, shape index: {}]  }
   0x1   :  { %v32_v0 = vld [vmem:[%s289_s1 + $0x78] sm:$0xff]  ;;  %144 = vmatprep.subr.mxu0 %v208_v1  ;;  %v31_v2 = vld [vmem:[%s289_s1 + $0x70] sm:$0xff]  ;;  %176 = vmatprep.mubr.msk.f32.mxu0 %vm209_vm0, %v208_v1  ;;  %v30_v3 = vld [vmem:[%s289_s1 + $0x68] sm:$0xff] }
   0x2   :  { %145 = vmatpush3.msra.mxu0 %v32_v0  ;;  %v29_v4 = vld [vmem:[%s289_s1 + $0x60] sm:$0xff] }
   0x3   :  { %146 = vmatprep.subr.mxu0 %v208_v1 }
   0x4   :  { %147 = vmatpush3.msra.mxu0 %v31_v2 }
   0x5   :  { %148 = vmatprep.subr.mxu0 %v208_v1 }
   0x6   :  { %9 = vsyncpa [#allocation4], 0  ;;  %149 = vmatpush3.msra.mxu0 %v30_v3  ;;  %v28_v5 = vld [vmem:[%s289_s1 + $0x58] sm:$0xff]  ;;  %v27_v6 = vld [vmem:[%s289_s1 + $0x50] sm:$0xff]  ;;  %v34_v18 = vstv %s290_s2  ;;  %vm111_vm1 = vcmask 25600  }
   0x7   :  { %150 = vmatprep.subr.mxu0 %v208_v1  ;;  %v26_v7 = vld [vmem:[%s289_s1 + $0x48] sm:$0xff]  ;;  %v25_v8 = vld [vmem:[%s289_s1 + $0x40] sm:$0xff]  ;;  %v24_v9 = vld [vmem:[%s289_s1 + $0x38] sm:$0xff] }
   0x8   :  { %151 = vmatpush3.msra.mxu0 %v29_v4  ;;  %v23_v10 = vld [vmem:[%s289_s1 + $0x30] sm:$0xff]  ;;  %v22_v11 = vld [vmem:[%s289_s1 + $0x28] sm:$0xff]  ;;  %v21_v12 = vld [vmem:[%s289_s1 + $0x20] sm:$0xff] }
   0x9   :  { %152 = vmatprep.subr.mxu0 %v208_v1  ;;  %v20_v13 = vld [vmem:[%s289_s1 + $0x18] sm:$0xff]  ;;  %v19_v14 = vld [vmem:[%s289_s1 + $0x10] sm:$0xff]  ;;  %v18_v15 = vld [vmem:[%s289_s1 + $0x8] sm:$0xff] }
   0xa   :  { %153 = vmatpush3.msra.mxu0 %v28_v5  ;;  %v17_v16 = vld [vmem:[%s289_s1] sm:$0xff]  ;;  %s210_s1 = smov [#allocation3]  }
   0xb   :  { %154 = vmatprep.subr.mxu0 %v208_v1  ;;  %v16_v17 = vld [vmem:[%s288_s0] sm:$0x3]  ;;  %s119_s21 = sshll.u32 %s210_s1, 4  ;;  %s120_s21 = int_to_ptr.vmem [resolvable:$true] %s119_s21 }
   0xc   :  { %155 = vmatpush3.msra.mxu0 %v27_v6  ;;  %s186_s0 = scalar_lea.vmem %s120_s21, 32  ;;  %p191_p1 = scmp.lt.s32.totalorder %s120_s21, %s120_s21 }
   0xd   :  { %156 = vmatprep.subr.mxu0 %v208_v1  ;;  %p187_p0 = scmp.ne.s32.totalorder %s120_s21, %s186_s0  ;;  %p192_p2 = scmp.lt.s32.totalorder %s186_s0, %s186_s0 }
   0xe   :  { %157 = vmatpush3.msra.mxu0 %v26_v7 }
   0xf   :  { %158 = vmatprep.subr.mxu0 %v208_v1  ;;  %p193_p3 = por %p192_p2, %p191_p1 }
  0x10   :  { %159 = vmatpush3.msra.mxu0 %v25_v8 }
  0x11   :  { %160 = vmatprep.subr.mxu0 %v208_v1  ;;  %p194_p4 = pnand %p193_p3, %p187_p0 }
  0x12   :  { %161 = vmatpush3.msra.mxu0 %v24_v9 }
  0x13   :  { %162 = vmatprep.subr.mxu0 %v208_v1 }
  0x14   :  { %163 = vmatpush3.msra.mxu0 %v23_v10 }
  0x15   :  { %164 = vmatprep.subr.mxu0 %v208_v1 }
  0x16   :  { %165 = vmatpush3.msra.mxu0 %v22_v11 }
  0x17   :  { %166 = vmatprep.subr.mxu0 %v208_v1 }
  0x18   :  { %167 = vmatpush3.msra.mxu0 %v21_v12 }
  0x19   :  { %168 = vmatprep.subr.mxu0 %v208_v1 }
  0x1a   :  { %169 = vmatpush3.msra.mxu0 %v20_v13 }
  0x1b   :  { %170 = vmatprep.subr.mxu0 %v208_v1 }
  0x1c   :  { %171 = vmatpush3.msra.mxu0 %v19_v14 }
  0x1d   :  { %172 = vmatprep.subr.mxu0 %v208_v1 }
  0x1e   :  { %173 = vmatpush3.msra.mxu0 %v18_v15 }
  0x1f   :  { %174 = vmatprep.subr.mxu0 %v208_v1 }
  0x20   :  { %175 = vmatpush3.msra.mxu0 %v17_v16 }
  0x21   :  { %177 = vmatmul.mubr.f32.vlgmr.msra.gmra.mxu0 %v16_v17 }
  0xe1   :  { %v101_v19 = vpop.f32.mrf.mxu0 }
  0xe2   :  { %v102_v20 = vadd.f32 %v101_v19, %v34_v18 }
  0xe3   :  { %v178_v21 = vpop.f32.mrf.mxu0 }
  0xe4   :  { %v105_v22 = vsub.f32 0.0, %v102_v20 }
  0xe6   :  { %v106_v23 = vmul.f32 1.442695, %v105_v22 }
  0xe8   :  { %182 = vpow2.f32 %v106_v23 }
  0xf5   :  { %v183_v24 = vpop.eup %182 }
  0xf6   :  { %v108_v25 = vadd.f32 1.0, %v183_v24 }
  0xf8   :  { %184 = vrcp.f32 %v108_v25 }
 0x105   :  { %v185_v26 = vpop.eup %184 }
 0x106   :  { %112 = vst.msk [vmem:[#allocation3] sm:$0x3] %vm111_vm1, %v185_v26 }
 0x107   :  { %197 = shalt.err (!%p194_p4)
}
 0x108   :  { %122 = dma.vmem_to_hbm [thread:$0]  %s120_s21, 32, %s291_s3, [#allocation4]  }
 0x109   :  { %206 = dma.done.wait [#allocation4], 32  }
 0x10a   :  { %207 = vsyncadd [#allocation4], 4294967264 }
 0x10b   :  { %126 = vsyncpa [#allocation4], 1 }

</bundles_post_ra>
